<compile_context>
chip_gen: v5e
topology: v5e:2x2
jax: 0.10.0
libtpu: 0.0.40
codegen_flags: <defaults>
</compile_context>

<pallas_src>
import math

import jax
import jax.numpy as jnp
from jax.experimental import pallas as pl
from jax.experimental.pallas import tpu as pltpu

# MXU operand dtype (accumulation is always f32 via preferred_element_type) and
# the HBM dtype of the inter-level feature tensor.  Set both to jnp.float32 for
# an exact-f32 (slower) build.
MXU_DTYPE = jnp.bfloat16
FEAT_DTYPE = jnp.bfloat16

# Polyphase taps of the StyleGAN2 blur-upsample (kernel [1,3,3,1], factor 2) on
# the 1-pixel zero-padded input: phase 0 -> 0.25*x[i-1]+0.75*x[i],
# phase 1 -> 0.75*x[i]+0.25*x[i+1].  Offsets index the padded array.
_TAPS = {0: ((0, 0.25), (1, 0.75)), 1: ((1, 0.75), (2, 0.25))}

# conv3x3 (pad=1) applied to a 2x phase-interleaved image, re-expressed on the
# low-res phase slabs: (output_phase, conv_tap d) -> (input_phase, low-res offset)
_CONV_PHASE = {
    (0, 0): (1, -1), (0, 1): (0, 0), (0, 2): (1, 0),
    (1, 0): (0, 0),  (1, 1): (1, 0), (1, 2): (0, 1),
}


def _round_up(x, m):
    return (x + m - 1) // m * m


def _geom(h, w):
    """Column-padded flattened-slab geometry for an (h, w) image."""
    wp = _round_up(w + 2, 8)          # padded width, sublane-aligned dy taps
    base = _round_up(wp + 8, 16)      # content start row, bf16-pack aligned
    off = base - wp                   # tap base so tap(1,1) hits `base` exactly
    lx = h * wp                       # slab rows
    rows = _round_up(base + lx + wp + 8, 16)
    return wp, lx, off, base, rows


def _slab_ops(wp, lx, off, base, rows, w):
    """In-kernel helpers working on zero-padded stencil scratches."""

    def zero_pads(ref, k):
        c = ref.shape[-1]
        dt = ref.dtype
        ref[k, 0:base, :] = jnp.zeros((base, c), dt)
        ref[k, base + lx:rows, :] = jnp.zeros((rows - base - lx, c), dt)

    def store(ref, k, slab):
        ref[k, base:base + lx, :] = slab.astype(ref.dtype)

    def tap(ref, k, dy, dx):
        s = off - 1 + dy * wp + dx      # static offset; VMEM view, no HBM copy
        return ref[k, s:s + lx, :]

    def blur_phase(ref, k, a, b):
        acc = None
        for dy, wy in _TAPS[a]:
            for dx, wx in _TAPS[b]:
                t = (wy * wx) * tap(ref, k, dy, dx).astype(jnp.float32)
                acc = t if acc is None else acc + t
        return acc

    def col_mask():
        col = jax.lax.broadcasted_iota(jnp.int32, (lx, 1), 0) % wp
        return ((col >= 1) & (col <= w)).astype(jnp.float32)

    return zero_pads, store, tap, blur_phase, col_mask


_VMEM_LIMIT_CACHE = []


def _vmem_limit_bytes():
    """Generation-aware scoped VMEM limit (~3/4 of physical, capped)."""
    if not _VMEM_LIMIT_CACHE:
        try:
            cap = int(pltpu.get_tpu_info().vmem_capacity_bytes)
            limit = min(cap * 3 // 4, 112 * 1024 * 1024)
        except Exception:
            limit = 48 * 1024 * 1024    # safe on every generation
        _VMEM_LIMIT_CACHE.append(int(limit))
    return _VMEM_LIMIT_CACHE[0]


def _cparams():
    return pltpu.CompilerParams(
        dimension_semantics=("parallel",),
        vmem_limit_bytes=_vmem_limit_bytes())


# ------------------------------ JAX glue -------------------------------------

def image_to_slab(x):
    """NHWC -> column-padded flattened slab (N, H*Wp, C) (dtype preserved)."""
    n, h, w, c = x.shape
    wp = _geom(h, w)[0]
    xp = jnp.pad(x, ((0, 0), (0, 0), (1, wp - w - 1), (0, 0)))
    return xp.reshape(n, h * wp, c)


def slab_to_image(s, h, w):
    n, _, c = s.shape
    wp = _geom(h, w)[0]
    return s.reshape(n, h, wp, c)[:, :, 1:w + 1, :]


def folded_phases_to_image(ph, h, w, c):
    """Lane-folded phase slabs (N, h*Wp, 4*c) -> interleaved (N, 2h, 2w, c)."""
    n = ph.shape[0]
    wp = _geom(h, w)[0]
    x = ph.reshape(n, h, wp, 2, 2, c)[:, :, 1:w + 1]      # (N, h, w, a, b, c)
    x = jnp.transpose(x, (0, 1, 3, 2, 4, 5))               # (N, h, 2, w, 2, c)
    return x.reshape(n, 2 * h, 2 * w, c)


# ----------------------------- Pallas kernels ---------------------------------

def to_rgb_head(xslab, scale, shift, w_rgb, b_rgb, apply_sigmoid=False):
    """Fused BN(eval) + ReLU + 1x1 conv on a slab (used only for to_rgb1)."""
    n, lx, c = xslab.shape
    w_rgb = w_rgb.astype(MXU_DTYPE)

    def kernel(x_ref, s_ref, t_ref, w_ref, b_ref, o_ref):
        act = jnp.maximum(x_ref[...] * s_ref[...] + t_ref[...], 0.0)
        out = jnp.dot(act.astype(MXU_DTYPE), w_ref[...],
                      preferred_element_type=jnp.float32) + b_ref[...]
        if apply_sigmoid:
            out = jax.nn.sigmoid(out)
        o_ref[...] = out

    return pl.pallas_call(
        kernel,
        out_shape=jax.ShapeDtypeStruct((n, lx, 3), jnp.float32),
        grid=(n,),
        in_specs=[
            pl.BlockSpec((None, lx, c), lambda i: (i, 0, 0)),
            pl.BlockSpec((1, c), lambda i: (0, 0)),
            pl.BlockSpec((1, c), lambda i: (0, 0)),
            pl.BlockSpec((c, 3), lambda i: (0, 0)),
            pl.BlockSpec((1, 3), lambda i: (0, 0)),
        ],
        out_specs=pl.BlockSpec((None, lx, 3), lambda i: (i, 0, 0)),
        compiler_params=_cparams(),
    )(xslab, scale, shift, w_rgb, b_rgb)


def fused_up_block_rgb(xslab, accslab, bp, rp, h, w, *, last_level):
    """Fused residual up-block + to_rgb + StyleGAN2 RGB-skip accumulation.

    Inputs:  feature slab (N, lx, Cin) and RGB accumulator slab (N, lx, 3) at
             the level's input geometry (h, w).
    Outputs: [if not last] feature phases lane-folded (N, lx, 4*Cout) bf16,
             RGB accumulator phases lane-folded (N, lx, 12) f32 (sigmoid'd on
             the last level).
    """
    n, lx_in, cin = xslab.shape
    cout = int(bp["b1"].shape[-1])
    wp, lx, off, base, rows = _geom(h, w)
    assert lx_in == lx and accslab.shape[1] == lx

    zero_pads, store, tap, blur_phase, col_mask = _slab_ops(
        wp, lx, off, base, rows, w)

    w1 = bp["w1"].reshape(9, cin, cout).astype(MXU_DTYPE)
    w2 = bp["w2"].reshape(9, cout, cout).astype(MXU_DTYPE)
    ws = bp["ws"].astype(MXU_DTYPE)
    wr = rp["w"].astype(MXU_DTYPE)

    def conv_phase(ref, wref, a, b):
        # 3x3 conv on the virtual 2x image, output phase (a, b), expressed on
        # the zero-padded low-res phase slabs: 9 bf16 MXU dots, f32 accumulate.
        acc = None
        for dy in range(3):
            pr, rr = _CONV_PHASE[(a, dy)]
            for dx in range(3):
                pc, rc = _CONV_PHASE[(b, dx)]
                t = tap(ref, 2 * pr + pc, rr + 1, rc + 1)
                d = jnp.dot(t, wref[dy * 3 + dx],
                            preferred_element_type=jnp.float32)
                acc = d if acc is None else acc + d
        return acc

    def kernel(x_ref, a_ref, s1, t1, w1_ref, b1, s2, t2, w2_ref, b2,
               ws_ref, bs, s3, t3, wr_ref, br, *rest):
        n_out = 1 if last_level else 2
        if last_level:
            f_ref = None
            acc_ref = rest[0]
        else:
            f_ref, acc_ref = rest[0], rest[1]
        ypad, uph, hph, spad, apad = rest[n_out:]

        # Zero the pad head/tail rows of every scratch plane.  Done every grid
        # step (not only program_id==0) so the kernel stays correct if the
        # batch axis is sharded across TensorCores (per-core scratch starts
        # uninitialised).  Pad region is ~2*wp rows per plane vs h*wp content.
        zero_pads(ypad, 0)
        zero_pads(spad, 0)
        zero_pads(apad, 0)
        for k in range(4):
            zero_pads(uph, k)
            zero_pads(hph, k)

        mask = col_mask()                                  # built once
        x = x_ref[...].astype(jnp.float32)

        # main path: BN1 (folded eval stats) + ReLU, pad columns re-zeroed
        store(ypad, 0, jnp.maximum(x * s1[...] + t1[...], 0.0) * mask)

        # blur-upsample: 4 phases of the (virtual) 2x image, bf16 MXU-LHS
        for a in (0, 1):
            for b in (0, 1):
                store(uph, 2 * a + b, blur_phase(ypad, 0, a, b) * mask)

        # conv3x3 #1 (+b1) -> BN2 + ReLU, per output phase, bf16 MXU-LHS
        for a in (0, 1):
            for b in (0, 1):
                c1 = conv_phase(uph, w1_ref, a, b) + b1[...]
                store(hph, 2 * a + b,
                      jnp.maximum(c1 * s2[...] + t2[...], 0.0) * mask)

        # skip branch: 1x1 conv at LOW resolution (commutes with the blur);
        # x's pad columns are exact zeros so no mask is needed.
        store(spad, 0, jnp.dot(x.astype(MXU_DTYPE), ws_ref[...],
                               preferred_element_type=jnp.float32))

        # RGB accumulator (3 ch) to be blur-upsampled; re-mask pad columns.
        # TODO(synk): lane-pack this 3-channel scratch at production sizes.
        store(apad, 0, a_ref[...].astype(jnp.float32) * mask)

        # conv3x3 #2 (+b2) + blur-upsampled skip (+bs) -> feature phase;
        # fused to_rgb (BN3+ReLU+1x1) added to the blur-upsampled accumulator.
        f_vals, acc_vals = [], []
        for a in (0, 1):
            for b in (0, 1):
                f_val = (conv_phase(hph, w2_ref, a, b) + b2[...]
                         + blur_phase(spad, 0, a, b) + bs[...])
                act = jnp.maximum(f_val * s3[...] + t3[...], 0.0)
                rgb = jnp.dot(act.astype(MXU_DTYPE), wr_ref[...],
                              preferred_element_type=jnp.float32) + br[...]
                acc_v = blur_phase(apad, 0, a, b) + rgb
                if last_level:
                    acc_v = jax.nn.sigmoid(acc_v)
                acc_vals.append(acc_v)
                if not last_level:
                    f_vals.append(f_val)

        # lane-dense stores: phases folded into the channel/lane axis
        acc_ref[...] = jnp.concatenate(acc_vals, axis=-1)
        if not last_level:
            f_ref[...] = jnp.concatenate(f_vals, axis=-1).astype(f_ref.dtype)

    out_shape = [jax.ShapeDtypeStruct((n, lx, 12), jnp.float32)]
    out_specs = [pl.BlockSpec((None, lx, 12), lambda i: (i, 0, 0))]
    if not last_level:
        out_shape = [jax.ShapeDtypeStruct((n, lx, 4 * cout), FEAT_DTYPE)] + out_shape
        out_specs = [pl.BlockSpec((None, lx, 4 * cout), lambda i: (i, 0, 0))] + out_specs

    return pl.pallas_call(
        kernel,
        out_shape=tuple(out_shape),
        grid=(n,),
        in_specs=[
            pl.BlockSpec((None, lx, cin), lambda i: (i, 0, 0)),
            pl.BlockSpec((None, lx, 3), lambda i: (i, 0, 0)),
            pl.BlockSpec((1, cin), lambda i: (0, 0)),
            pl.BlockSpec((1, cin), lambda i: (0, 0)),
            pl.BlockSpec((9, cin, cout), lambda i: (0, 0, 0)),
            pl.BlockSpec((1, cout), lambda i: (0, 0)),
            pl.BlockSpec((1, cout), lambda i: (0, 0)),
            pl.BlockSpec((1, cout), lambda i: (0, 0)),
            pl.BlockSpec((9, cout, cout), lambda i: (0, 0, 0)),
            pl.BlockSpec((1, cout), lambda i: (0, 0)),
            pl.BlockSpec((cin, cout), lambda i: (0, 0)),
            pl.BlockSpec((1, cout), lambda i: (0, 0)),
            pl.BlockSpec((1, cout), lambda i: (0, 0)),
            pl.BlockSpec((1, cout), lambda i: (0, 0)),
            pl.BlockSpec((cout, 3), lambda i: (0, 0)),
            pl.BlockSpec((1, 3), lambda i: (0, 0)),
        ],
        out_specs=tuple(out_specs),
        scratch_shapes=[
            pltpu.VMEM((1, rows, cin), jnp.float32),   # padded BN+ReLU'd input
            pltpu.VMEM((4, rows, cin), MXU_DTYPE),     # upsample phases (conv1 LHS)
            pltpu.VMEM((4, rows, cout), MXU_DTYPE),    # conv1+BN+ReLU phases (conv2 LHS)
            pltpu.VMEM((1, rows, cout), jnp.float32),  # low-res skip
            pltpu.VMEM((1, rows, 3), jnp.float32),     # RGB accumulator
        ],
        compiler_params=_cparams(),
    )(xslab, accslab,
      bp["scale1"], bp["shift1"], w1, bp["b1"],
      bp["scale2"], bp["shift2"], w2, bp["b2"],
      bp["ws"], bp["bs"],
      rp["scale"], rp["shift"], wr, rp["b"])


# ------------------------------ model wiring ----------------------------------

def decoder_forward(feat, params):
    """feat: NHWC float32.  Returns (sigmoid image NHWC, None)."""
    n, h, w, _ = feat.shape
    num_up = params["num_up_blocks"]

    xslab = image_to_slab(feat.astype(jnp.float32))
    p0 = params["to_rgb1"]
    acc = to_rgb_head(xslab, p0["scale"], p0["shift"], p0["w"], p0["b"],
                      apply_sigmoid=(num_up == 0))
    if num_up == 0:
        return slab_to_image(acc, h, w), None

    f = xslab
    ch, cw = h, w
    acc_ph = None
    for i in range(num_up):
        bp, rp = params["blocks"][i], params["to_rgbs"][i]
        last = (i == num_up - 1)
        outs = fused_up_block_rgb(f, acc, bp, rp, ch, cw, last_level=last)
        if last:
            acc_ph = outs[0] if isinstance(outs, (tuple, list)) else outs
        else:
            f_ph, acc_ph = outs
            cout = int(bp["b1"].shape[-1])
            # TODO(synk): this inter-level relayout (transpose+pad of f) still
            # runs in XLA; writing the interleaved next-level slab from inside
            # the kernel would remove it entirely.
            f = image_to_slab(folded_phases_to_image(f_ph, ch, cw, cout))
            acc = image_to_slab(folded_phases_to_image(acc_ph, ch, cw, 3))
        ch, cw = 2 * ch, 2 * cw

    img = folded_phases_to_image(acc_ph, ch // 2, cw // 2, 3)
    return img, None


# ----------------------- pure-JAX reference (literal order) -------------------

def decoder_forward_ref(feat, params, mxu_dtype=jnp.float32):
    """Literal module order.  mxu_dtype controls the matmul operand cast so a
    bf16-matched reference can be produced for a tight comparison."""
    bf = (mxu_dtype != jnp.float32)
    cast = (lambda v: v.astype(mxu_dtype)) if bf else (lambda v: v)

    def mm(a, b):
        return jnp.einsum("nhwc,co->nhwo", cast(a), cast(b),
                          precision="highest",
                          preferred_element_type=jnp.float32)

    def bn_relu(x, sc, sh):
        return jnp.maximum(x * sc[0] + sh[0], 0.0)

    def c1(x, w, b):
        return mm(x, w) + b[0]

    def c3(x, w, b):
        _, hh, ww, _ = x.shape
        xp = jnp.pad(x, ((0, 0), (1, 1), (1, 1), (0, 0)))
        acc = 0.0
        for dy in range(3):
            for dx in range(3):
                acc = acc + mm(xp[:, dy:dy + hh, dx:dx + ww, :], w[dy, dx])
        return acc + b[0]

    def up(x):
        n, hh, ww, cc = x.shape
        xp = jnp.pad(x, ((0, 0), (1, 1), (1, 1), (0, 0)))
        ph = {}
        for a in (0, 1):
            for b in (0, 1):
                acc = 0.0
                for dy, wy in _TAPS[a]:
                    for dx, wx in _TAPS[b]:
                        acc = acc + wy * wx * xp[:, dy:dy + hh, dx:dx + ww, :]
                ph[(a, b)] = acc
        r0 = jnp.stack([ph[(0, 0)], ph[(0, 1)]], axis=3).reshape(n, hh, 2 * ww, cc)
        r1 = jnp.stack([ph[(1, 0)], ph[(1, 1)]], axis=3).reshape(n, hh, 2 * ww, cc)
        return jnp.stack([r0, r1], axis=2).reshape(n, 2 * hh, 2 * ww, cc)

    def block(x, p):
        h_ = c3(up(bn_relu(x, p["scale1"], p["shift1"])), p["w1"], p["b1"])
        h_ = c3(bn_relu(h_, p["scale2"], p["shift2"]), p["w2"], p["b2"])
        return h_ + c1(up(x), p["ws"], p["bs"])

    num_up = params["num_up_blocks"]
    p = params["to_rgb1"]
    f = feat.astype(jnp.float32)
    images = [c1(bn_relu(f, p["scale"], p["shift"]), p["w"], p["b"])]
    for i in range(num_up):
        fr = block(f, params["blocks"][i])
        rp = params["to_rgbs"][i]
        images.append(c1(bn_relu(fr, rp["scale"], rp["shift"]), rp["w"], rp["b"]))
        # mirror the kernel's bf16 inter-level feature storage
        f = fr.astype(mxu_dtype).astype(jnp.float32) if bf else fr
    img = images[-1]
    k = 1
    for im in images[-2::-1]:
        skip = up(im)
        for _ in range(k - 1):
            skip = up(skip)
        img = img + skip
        k += 1
    return jax.nn.sigmoid(img), None


# ------------------------------ parameter init --------------------------------

def init_params(key, image_size, gen_latent_texture_size, shared_in_channels,
                gen_num_channels):
    num_up = int(math.log(image_size // gen_latent_texture_size, 2))
    keys = iter(jax.random.split(key, 128))

    def nrm(shape, s=0.1):
        return s * jax.random.normal(next(keys), shape, jnp.float32)

    def bn(c):
        gamma = 1.0 + nrm((1, c), 0.05)
        beta = nrm((1, c), 0.05)
        # eval-mode BatchNorm2d: running_mean=0, running_var=1, eps=1e-5 folded.
        scale = gamma / jnp.sqrt(1.0 + 1e-5)
        return scale, beta

    params = {"num_up_blocks": num_up}
    s, t = bn(shared_in_channels)
    params["to_rgb1"] = dict(scale=s, shift=t,
                             w=nrm((shared_in_channels, 3)), b=nrm((1, 3), 0.01))
    blocks, rgbs = [], []
    cin = shared_in_channels
    for _ in range(num_up):
        cout = max(cin // 2, gen_num_channels)
        s1, t1 = bn(cin)
        s2, t2 = bn(cout)
        blocks.append(dict(
            scale1=s1, shift1=t1,
            w1=nrm((3, 3, cin, cout)), b1=nrm((1, cout), 0.01),
            scale2=s2, shift2=t2,
            w2=nrm((3, 3, cout, cout)), b2=nrm((1, cout), 0.01),
            ws=nrm((cin, cout)), bs=jnp.zeros((1, cout), jnp.float32)))
        s3, t3 = bn(cout)
        rgbs.append(dict(scale=s3, shift=t3, w=nrm((cout, 3)), b=nrm((1, 3), 0.01)))
        cin = cout
    params["blocks"] = blocks
    params["to_rgbs"] = rgbs
    return params


# ----------------------------------- main --------------------------------------

if __name__ == "__main__":
    key = jax.random.PRNGKey(0)

    # Small but faithful config: 2 up-blocks (8 -> 16 -> 32).
    N = 2
    image_size = 32
    gen_latent_texture_size = 8
    shared_in_channels = 16
    gen_num_channels = 8

    params = init_params(key, image_size, gen_latent_texture_size,
                         shared_in_channels, gen_num_channels)

    # Module input is NCHW (PyTorch); transpose to NHWC for the kernels.
    feat_nchw = jax.random.normal(
        jax.random.fold_in(key, 123),
        (N, shared_in_channels, gen_latent_texture_size, gen_latent_texture_size),
        jnp.float32)
    feat = jnp.transpose(feat_nchw, (0, 2, 3, 1))

    img, aux = decoder_forward(feat, params)
    img = jax.block_until_ready(img)

    assert aux is None
    assert img.shape == (N, image_size, image_size, 3), img.shape

    # Tight check vs a reference with the same bf16 MXU-operand casts, and a
    # looser sanity check vs the exact-f32 literal-order reference.
    ref_mx, _ = decoder_forward_ref(feat, params, MXU_DTYPE)
    ref_f32, _ = decoder_forward_ref(feat, params, jnp.float32)
    err_mx = float(jnp.max(jnp.abs(img - ref_mx)))
    err_f32 = float(jnp.max(jnp.abs(img - ref_f32)))
    assert err_mx < 5e-3, f"mismatch vs bf16-matched reference: {err_mx}"
    assert err_f32 < 5e-2, f"mismatch vs f32 reference: {err_f32}"

    print("KERNEL_OK")
</pallas_src>

<mosaic_0001>
module attributes {stable_mosaic.version = 11 : i64} {
  func.func @kernel(%arg0: i32, %arg1: memref<1x128x16xf32, #tpu.memory_space<vmem>>, %arg2: memref<1x16xf32, #tpu.memory_space<vmem>>, %arg3: memref<1x16xf32, #tpu.memory_space<vmem>>, %arg4: memref<16x3xbf16, #tpu.memory_space<vmem>>, %arg5: memref<1x3xf32, #tpu.memory_space<vmem>>, %arg6: memref<1x128x3xf32, #tpu.memory_space<vmem>>) attributes {dimension_semantics = [#tpu.dimension_semantics<parallel>], iteration_bounds = array<i64: 2>, scalar_prefetch = 0 : i64, scratch_operands = 0 : i64, tpu.core_type = #tpu.core_type<tc>, window_params = [{transform_indices = @transform_0, window_bounds = array<i64: 1, 128, 16>}, {pipeline_mode = #tpu.pipeline_mode<synchronous>, transform_indices = @transform_1, window_bounds = array<i64: 1, 16>}, {pipeline_mode = #tpu.pipeline_mode<synchronous>, transform_indices = @transform_2, window_bounds = array<i64: 1, 16>}, {pipeline_mode = #tpu.pipeline_mode<synchronous>, transform_indices = @transform_3, window_bounds = array<i64: 16, 3>}, {pipeline_mode = #tpu.pipeline_mode<synchronous>, transform_indices = @transform_4, window_bounds = array<i64: 1, 3>}, {transform_indices = @transform_5, window_bounds = array<i64: 1, 128, 3>}]} {
    %c0 = arith.constant 0 : index
    %c0_0 = arith.constant 0 : index
    %c0_1 = arith.constant 0 : index
    %0 = vector.load %arg1[%c0, %c0_0, %c0_1] : memref<1x128x16xf32, #tpu.memory_space<vmem>>, vector<1x128x16xf32>
    %1 = vector.shape_cast %0 : vector<1x128x16xf32> to vector<128x16xf32>
    %c0_2 = arith.constant 0 : index
    %c0_3 = arith.constant 0 : index
    %2 = vector.load %arg2[%c0_2, %c0_3] : memref<1x16xf32, #tpu.memory_space<vmem>>, vector<1x16xf32>
    %3 = vector.broadcast %2 : vector<1x16xf32> to vector<128x16xf32>
    %4 = arith.mulf %1, %3 : vector<128x16xf32>
    %c0_4 = arith.constant 0 : index
    %c0_5 = arith.constant 0 : index
    %5 = vector.load %arg3[%c0_4, %c0_5] : memref<1x16xf32, #tpu.memory_space<vmem>>, vector<1x16xf32>
    %6 = vector.broadcast %5 : vector<1x16xf32> to vector<128x16xf32>
    %7 = arith.addf %4, %6 : vector<128x16xf32>
    %cst = arith.constant 0.000000e+00 : f32
    %8 = vector.broadcast %cst : f32 to vector<128x16xf32>
    %9 = arith.maximumf %7, %8 : vector<128x16xf32>
    %10 = arith.truncf %9 : vector<128x16xf32> to vector<128x16xbf16>
    %c0_6 = arith.constant 0 : index
    %c0_7 = arith.constant 0 : index
    %11 = vector.load %arg4[%c0_6, %c0_7] : memref<16x3xbf16, #tpu.memory_space<vmem>>, vector<16x3xbf16>
    %cst_8 = arith.constant dense<0.000000e+00> : vector<128x3xf32>
    %12 = tpu.matmul %10, %11, %cst_8 {dimension_numbers = #tpu.dot_dimension_numbers<[1], [0], [0], [1], [0, 0, 1, 1], [], []>} : vector<128x16xbf16>, vector<16x3xbf16>, vector<128x3xf32> -> vector<128x3xf32>
    %c0_9 = arith.constant 0 : index
    %c0_10 = arith.constant 0 : index
    %13 = vector.load %arg5[%c0_9, %c0_10] : memref<1x3xf32, #tpu.memory_space<vmem>>, vector<1x3xf32>
    %14 = vector.broadcast %13 : vector<1x3xf32> to vector<128x3xf32>
    %15 = arith.addf %12, %14 : vector<128x3xf32>
    %c0_11 = arith.constant 0 : index
    %c0_12 = arith.constant 0 : index
    %c0_13 = arith.constant 0 : index
    %16 = vector.load %arg6[%c0_11, %c0_12, %c0_13] : memref<1x128x3xf32, #tpu.memory_space<vmem>>, vector<1x128x3xf32>
    %17 = vector.shape_cast %16 : vector<1x128x3xf32> to vector<128x3xf32>
    %18 = vector.shape_cast %15 : vector<128x3xf32> to vector<1x128x3xf32>
    tpu.vector_store %arg6[%c0_11, %c0_12, %c0_13], %18 {strides = array<i32>} : memref<1x128x3xf32, #tpu.memory_space<vmem>>, vector<1x128x3xf32>,
    return
  }
  func.func @transform_0(%arg0: i32) -> (i32, i32, i32) {
    %c0_i32 = arith.constant 0 : i32
    %c0_i32_0 = arith.constant 0 : i32
    %c0_i32_1 = arith.constant 0 : i32
    return %arg0, %c0_i32, %c0_i32_0 : i32, i32, i32
  }
  func.func @transform_1(%arg0: i32) -> (i32, i32) {
    %c0_i32 = arith.constant 0 : i32
    %c0_i32_0 = arith.constant 0 : i32
    %c0_i32_1 = arith.constant 0 : i32
    return %c0_i32, %c0_i32_0 : i32, i32
  }
  func.func @transform_2(%arg0: i32) -> (i32, i32) {
    %c0_i32 = arith.constant 0 : i32
    %c0_i32_0 = arith.constant 0 : i32
    %c0_i32_1 = arith.constant 0 : i32
    return %c0_i32, %c0_i32_0 : i32, i32
  }
  func.func @transform_3(%arg0: i32) -> (i32, i32) {
    %c0_i32 = arith.constant 0 : i32
    %c0_i32_0 = arith.constant 0 : i32
    %c0_i32_1 = arith.constant 0 : i32
    return %c0_i32, %c0_i32_0 : i32, i32
  }
  func.func @transform_4(%arg0: i32) -> (i32, i32) {
    %c0_i32 = arith.constant 0 : i32
    %c0_i32_0 = arith.constant 0 : i32
    %c0_i32_1 = arith.constant 0 : i32
    return %c0_i32, %c0_i32_0 : i32, i32
  }
  func.func @transform_5(%arg0: i32) -> (i32, i32, i32) {
    %c0_i32 = arith.constant 0 : i32
    %c0_i32_0 = arith.constant 0 : i32
    %c0_i32_1 = arith.constant 0 : i32
    return %arg0, %c0_i32, %c0_i32_0 : i32, i32, i32
  }
}

</mosaic_0001>

<bundles_post_ra>
// kernel: tpu_custom_call.1
= control target key start
LH: loop header
LB: loop body
LE: loop exit
PB: predicated region body
PF: predicated region fallthrough
CT: control target
= control target key end

     0   :  { %s542_s18 = smov 0   ;;  %s656_s0 = inlined_call_operand.vmem [shape: f32[2,128,16], index: 0, kind: input, shape index: {}]   ;;  %s657_s1 = inlined_call_operand.vmem [shape: f32[1,16], index: 1, kind: input, shape index: {}]   ;;  %s658_s2 = inlined_call_operand.vmem [shape: f32[1,16], index: 2, kind: input, shape index: {}]   ;;  %s659_s3 = inlined_call_operand.vmem [shape: bf16[16,3], index: 3, kind: input, shape index: {}]   ;;  %s660_s4 = inlined_call_operand.vmem [shape: f32[1,3], index: 4, kind: input, shape index: {}]   ;;  %s661_s5 = inlined_call_operand.vmem [shape: f32[2,128,3], index: 5, kind: output, shape index: {}]  }
   0x1 LB: > { %s464_s19 = sadd.s32 4294967295, %s510_s18   ;;  %p468_p0 = scmp.ge.s32.totalorder %s510_s18, 1  ;;  %s510_s18 = sphi %s542_s18, %s15_s18  }
   0x2   : > { %p187_p1 = scmp.lt.s32.totalorder %s510_s18, 3 }
   0x4   : > { %p188_p2 = pnand %p468_p0, %p187_p1 }
   0x5   : > { %p215_p3 = scmp.lt.s32.totalorder (!%p188_p2), %s464_s19, 1 }
   0x6   : > { %191 = sbr.rel (%p188_p2) target bundleno = 185 (0xb9), region = 40 }
   0xb   : > { %v489_v0 = vld [vmem:[%s659_s3] sm:$0xff]  ;;  %s663_s19 = smov (!%p215_p3, %s464_s19), 1  ;;  %vm318_vm0 = vcmask 130048   ;;  %vm392_vm1 = vcmask 23552  }
   0xc   : > { %350 = vmatpush.bf16.msra.mxu0 %v489_v0  ;;  %490 = vmatpush.bf16.msra.mxu1 %v489_v0  ;;  %v501_v1 = vld [vmem:[%s657_s1] ss:$0 sm:$0xff]  ;;  %s487_s24 = sshll.u32 %s663_s19, 7 }
   0xd   : > { %491 = vmatpush.bf16.msra.mxu2 %v489_v0  ;;  %492 = vmatpush.bf16.msra.mxu3 %v489_v0  ;;  %s564_s27 = scalar_lea.vmem %s656_s0, %s487_s24  ;;  %v569_v2 = vld [vmem:[%s658_s2] ss:$0 sm:$0xff]  ;;  %s619_s9 = scalar_lea.vmem %s661_s5, %s487_s24 }
   0xe   : > { %v226_v3 = vld [vmem:[%s564_s27] sm:$0xff]  ;;  %v227_v4 = vld [vmem:[%s564_s27 + $0x8] sm:$0xff]  ;;  %v228_v29 = vld [vmem:[%s564_s27 + $0x10] sm:$0xff] }
   0xf   : > { %v230_v5 = vld [vmem:[%s564_s27 + $0x20] sm:$0xff]  ;;  %v246_v6 = vmul.f32 %v501_v1, %v226_v3  ;;  %v247_v7 = vmul.f32 %v501_v1, %v227_v4  ;;  %v231_v8 = vld [vmem:[%s564_s27 + $0x28] sm:$0xff]  ;;  %v229_v34 = vld [vmem:[%s564_s27 + $0x18] sm:$0xff]  ;;  %v248_v44 = vmul.f32 %v501_v1, %v228_v29 }
  0x10   : > { %v250_v9 = vmul.f32 %v501_v1, %v230_v5  ;;  %v234_v10 = vld [vmem:[%s564_s27 + $0x40] sm:$0xff]  ;;  %v235_v11 = vld [vmem:[%s564_s27 + $0x48] sm:$0xff]  ;;  %v251_v12 = vmul.f32 %v501_v1, %v231_v8  ;;  %v232_v35 = vld [vmem:[%s564_s27 + $0x30] sm:$0xff]  ;;  %v249_v45 = vmul.f32 %v501_v1, %v229_v34 }
  0x11   : > { %v254_v13 = vmul.f32 %v501_v1, %v234_v10  ;;  %v255_v14 = vmul.f32 %v501_v1, %v235_v11  ;;  %v238_v15 = vld [vmem:[%s564_s27 + $0x60] sm:$0xff]  ;;  %v239_v16 = vld [vmem:[%s564_s27 + $0x68] sm:$0xff]  ;;  %v266_v17 = vadd.f32 %v569_v2, %v246_v6  ;;  %v267_v18 = vadd.f32 %v569_v2, %v247_v7  ;;  %v233_v36 = vld [vmem:[%s564_s27 + $0x38] sm:$0xff] }
  0x12   : > { %v270_v19 = vadd.f32 %v569_v2, %v250_v9  ;;  %v258_v20 = vmul.f32 %v501_v1, %v238_v15  ;;  %v271_v21 = vadd.f32 %v569_v2, %v251_v12  ;;  %v259_v24 = vmul.f32 %v501_v1, %v239_v16  ;;  %v236_v39 = vld [vmem:[%s564_s27 + $0x50] sm:$0xff]  ;;  %v237_v40 = vld [vmem:[%s564_s27 + $0x58] sm:$0xff] }
  0x13   : > { %v274_v22 = vadd.f32 %v569_v2, %v254_v13  ;;  %v275_v23 = vadd.f32 %v569_v2, %v255_v14  ;;  %v282_v25 = vmax.f32 %v266_v17, 0.0  ;;  %v283_v26 = vmax.f32 %v267_v18, 0.0  ;;  %v240_v48 = vld [vmem:[%s564_s27 + $0x70] sm:$0xff]  ;;  %v241_v49 = vld [vmem:[%s564_s27 + $0x78] sm:$0xff] }
  0x14   : > { %v286_v27 = vmax.f32 %v270_v19, 0.0  ;;  %v278_v28 = vadd.f32 %v569_v2, %v258_v20  ;;  %v287_v30 = vmax.f32 %v271_v21, 0.0  ;;  %v279_v33 = vadd.f32 %v569_v2, %v259_v24 }
  0x15   : > { %v290_v31 = vmax.f32 %v274_v22, 0.0  ;;  %v291_v32 = vmax.f32 %v275_v23, 0.0  ;;  %v298_v37 = vpack.c.bf16 %v283_v26, %v282_v25  ;;  %v252_v46 = vmul.f32 %v501_v1, %v232_v35 }
  0x16   : > { %v294_v38 = vmax.f32 %v278_v28, 0.0  ;;  %v300_v41 = vpack.c.bf16 %v287_v30, %v286_v27  ;;  %v295_v43 = vmax.f32 %v279_v33, 0.0  ;;  %v253_v47 = vmul.f32 %v501_v1, %v233_v36 }
  0x17   : > { %v302_v42 = vpack.c.bf16 %v291_v32, %v290_v31  ;;  %477 = vmatmul.msk.bf16.vlgmr.msra.gmra.mxu0 %vm318_vm0, %v298_v37  ;;  %v256_v51 = vmul.f32 %v501_v1, %v236_v39  ;;  %v257_v52 = vmul.f32 %v501_v1, %v237_v40  ;;  %v260_v53 = vmul.f32 %v501_v1, %v240_v48 }
  0x18   : > { %479 = vmatmul.msk.bf16.vlgmr.msra.gmra.mxu1 %vm318_vm0, %v300_v41  ;;  %v304_v50 = vpack.c.bf16 %v295_v43, %v294_v38  ;;  %v261_v54 = vmul.f32 %v501_v1, %v241_v49  ;;  %v268_v55 = vadd.f32 %v569_v2, %v248_v44  ;;  %v269_v56 = vadd.f32 %v569_v2, %v249_v45 }
  0x19   : > { %481 = vmatmul.msk.bf16.vlgmr.msra.gmra.mxu2 %vm318_vm0, %v302_v42  ;;  %v272_v57 = vadd.f32 %v569_v2, %v252_v46  ;;  %v273_v58 = vadd.f32 %v569_v2, %v253_v47  ;;  %v276_v59 = vadd.f32 %v569_v2, %v256_v51  ;;  %v277_v60 = vadd.f32 %v569_v2, %v257_v52 }
  0x1a   : > { %483 = vmatmul.msk.bf16.vlgmr.msra.gmra.mxu3 %vm318_vm0, %v304_v50  ;;  %v280_v61 = vadd.f32 %v569_v2, %v260_v53  ;;  %v281_v62 = vadd.f32 %v569_v2, %v261_v54  ;;  %v284_v63 = vmax.f32 %v268_v55, 0.0  ;;  %v285_v0 = vmax.f32 %v269_v56, 0.0  ;;  %v503_v2 = vld [vmem:[%s660_s4] ss:$0 sm:$0xff] }
  0x1b   : > { %v288_v1 = vmax.f32 %v272_v57, 0.0  ;;  %v289_v3 = vmax.f32 %v273_v58, 0.0  ;;  %v292_v4 = vmax.f32 %v276_v59, 0.0  ;;  %v293_v5 = vmax.f32 %v277_v60, 0.0 }
  0x1c   : > { %v296_v6 = vmax.f32 %v280_v61, 0.0  ;;  %v297_v7 = vmax.f32 %v281_v62, 0.0  ;;  %v299_v8 = vpack.c.bf16 %v285_v0, %v284_v63 }
  0x1d   : > { %v301_v9 = vpack.c.bf16 %v289_v3, %v288_v1  ;;  %v303_v10 = vpack.c.bf16 %v293_v5, %v292_v4 }
  0x1e   : > { %v305_v11 = vpack.c.bf16 %v297_v7, %v296_v6 }
  0x27   : > { %478 = vmatmul.msk.bf16.gmra.mxu0 %vm318_vm0, %v299_v8 }
  0x28   : > { %480 = vmatmul.msk.bf16.gmra.mxu1 %vm318_vm0, %v301_v9 }
  0x29   : > { %482 = vmatmul.msk.bf16.gmra.mxu2 %vm318_vm0, %v303_v10 }
  0x2a   : > { %484 = vmatmul.msk.bf16.gmra.mxu3 %vm318_vm0, %v305_v11 }
  0x94   : > { %v352_v12 = vpop.f32.mrf.mxu0 }
  0x95   : > { %v353_v13 = vadd.f32 %v503_v2, %v352_v12  ;;  %v362_v14 = vpop.f32.mrf.mxu1 }
  0x96   : > { %v363_v15 = vadd.f32 %v503_v2, %v362_v14 }
  0x97   : > { %393 = vst.msk [vmem:[%s619_s9] sm:$0xff] %vm392_vm1, %v353_v13 }
  0x98   : > { %397 = vst.msk [vmem:[%s619_s9 + $0x20] sm:$0xff] %vm392_vm1, %v363_v15 }
  0x9c   : > { %v372_v16 = vpop.f32.mrf.mxu2  ;;  %v354_v18 = vpop.f32.mrf.mxu0 }
  0x9d   : > { %v373_v17 = vadd.f32 %v503_v2, %v372_v16  ;;  %v382_v19 = vpop.f32.mrf.mxu3  ;;  %v355_v20 = vadd.f32 %v503_v2, %v354_v18  ;;  %v364_v21 = vpop.f32.mrf.mxu1 }
  0x9e   : > { %v383_v22 = vadd.f32 %v503_v2, %v382_v19  ;;  %v365_v23 = vadd.f32 %v503_v2, %v364_v21 }
  0x9f   : > { %401 = vst.msk [vmem:[%s619_s9 + $0x40] sm:$0xff] %vm392_vm1, %v373_v17 }
  0xa0   : > { %394 = vst.msk [vmem:[%s619_s9 + $0x8] sm:$0xff] %vm392_vm1, %v355_v20 }
  0xa1   : > { %405 = vst.msk [vmem:[%s619_s9 + $0x60] sm:$0xff] %vm392_vm1, %v383_v22 }
  0xa2   : > { %398 = vst.msk [vmem:[%s619_s9 + $0x28] sm:$0xff] %vm392_vm1, %v365_v23 }
  0xa4   : > { %v374_v24 = vpop.f32.mrf.mxu2  ;;  %v357_v26 = vpop.f32.mrf.mxu0 }
  0xa5   : > { %v375_v25 = vadd.f32 %v503_v2, %v374_v24  ;;  %v384_v27 = vpop.f32.mrf.mxu3  ;;  %v358_v28 = vadd.f32 %v503_v2, %v357_v26  ;;  %v367_v29 = vpop.f32.mrf.mxu1 }
  0xa6   : > { %v385_v30 = vadd.f32 %v503_v2, %v384_v27  ;;  %v368_v31 = vadd.f32 %v503_v2, %v367_v29 }
  0xa7   : > { %402 = vst.msk [vmem:[%s619_s9 + $0x48] sm:$0xff] %vm392_vm1, %v375_v25 }
  0xa8   : > { %395 = vst.msk [vmem:[%s619_s9 + $0x10] sm:$0xff] %vm392_vm1, %v358_v28 }
  0xa9   : > { %406 = vst.msk [vmem:[%s619_s9 + $0x68] sm:$0xff] %vm392_vm1, %v385_v30 }
  0xaa   : > { %399 = vst.msk [vmem:[%s619_s9 + $0x30] sm:$0xff] %vm392_vm1, %v368_v31 }
  0xac   : > { %v377_v32 = vpop.f32.mrf.mxu2  ;;  %v359_v34 = vpop.f32.mrf.mxu0 }
  0xad   : > { %v378_v33 = vadd.f32 %v503_v2, %v377_v32  ;;  %v387_v35 = vpop.f32.mrf.mxu3  ;;  %v360_v36 = vadd.f32 %v503_v2, %v359_v34  ;;  %v369_v37 = vpop.f32.mrf.mxu1 }
  0xae   : > { %v388_v38 = vadd.f32 %v503_v2, %v387_v35  ;;  %v370_v39 = vadd.f32 %v503_v2, %v369_v37 }
  0xaf   : > { %403 = vst.msk [vmem:[%s619_s9 + $0x50] sm:$0xff] %vm392_vm1, %v378_v33 }
  0xb0   : > { %396 = vst.msk [vmem:[%s619_s9 + $0x18] sm:$0xff] %vm392_vm1, %v360_v36 }
  0xb1   : > { %407 = vst.msk [vmem:[%s619_s9 + $0x70] sm:$0xff] %vm392_vm1, %v388_v38 }
  0xb2   : > { %400 = vst.msk [vmem:[%s619_s9 + $0x38] sm:$0xff] %vm392_vm1, %v370_v39 }
  0xb4   : > { %v379_v40 = vpop.f32.mrf.mxu2 }
  0xb5   : > { %v380_v41 = vadd.f32 %v503_v2, %v379_v40  ;;  %v389_v42 = vpop.f32.mrf.mxu3 }
  0xb6   : > { %v390_v43 = vadd.f32 %v503_v2, %v389_v42 }
  0xb7   : > { %404 = vst.msk [vmem:[%s619_s9 + $0x58] sm:$0xff] %vm392_vm1, %v380_v41 }
  0xb8   : > { %408 = vst.msk [vmem:[%s619_s9 + $0x78] sm:$0xff] %vm392_vm1, %v390_v43 }
  0xb9 PF: > { %s15_s18 = sadd.s32 1, %s510_s18  }
  0xba   : > { %p12_p4 = scmp.ge.s32.totalorder %s15_s18, 4  }
  0xbc   :  { %14 = sbr.rel (!%p12_p4) target bundleno = 1 (0x1), region = 70 }

</bundles_post_ra>
